<compile_context>
chip_gen: v7x
topology: tpu7x:2x2x1
jax: 0.10.0
libtpu: 0.0.40
codegen_flags: <defaults>
</compile_context>

<pallas_src>
import functools

import jax
import jax.numpy as jnp
import numpy as np
from jax import lax
from jax.experimental import pallas as pl
from jax.experimental.pallas import tpu as pltpu


# ----------------------------------------------------------------------------
# Kernels
# ----------------------------------------------------------------------------
def _flat_kernel(invk_ref, depth_ref, out_ref, *, sb, width):
    """Lane-dense path: image flattened to (HP, 128) pixel tiles.

    invk_ref : SMEM (B, 9)          per-batch inverse intrinsics (top-left 3x3)
    depth_ref: VMEM (1, sb, 128)    depth tile (native dtype)
    out_ref  : VMEM (1, 4, sb, 128) cam points (x, y, z, 1), f32
    """
    b = pl.program_id(0)
    c = pl.program_id(1)

    depth = depth_ref[0].astype(jnp.float32)                      # (sb, 128)

    # Global flat pixel index of every element in this tile.
    row0 = c * sb
    i = ((row0 + lax.broadcasted_iota(jnp.int32, (sb, 128), 0)) * 128
         + lax.broadcasted_iota(jnp.int32, (sb, 128), 1)).astype(jnp.float32)

    # Decode x = i % W, y = i // W without integer division: reciprocal
    # multiply + one-step fixup.  Exact because the wrapper only takes this
    # path when H*W < 2**23 (flat indices representable exactly in f32 and the
    # estimate is always within +-1 of the truth).
    w = jnp.float32(width)
    y = jnp.floor(i * jnp.float32(1.0 / width))
    x = i - y * w
    y = jnp.where(x < 0.0, y - 1.0, y)
    x = jnp.where(x < 0.0, x + w, x)
    y = jnp.where(x >= w, y + 1.0, y)
    x = jnp.where(x >= w, x - w, x)

    # 3x3 @ [x, y, 1] as scalar-broadcast FMAs on the VPU; depth folded in.
    for r in range(3):
        k0 = invk_ref[b, 3 * r + 0]
        k1 = invk_ref[b, 3 * r + 1]
        k2 = invk_ref[b, 3 * r + 2]
        out_ref[0, r] = ((k0 * x + k1 * y + k2) * depth).astype(out_ref.dtype)

    # Homogeneous coordinate plane (kept to match the torch module's output).
    out_ref[0, 3] = jnp.ones((sb, 128), out_ref.dtype)


def _rows_kernel(invk_ref, depth_ref, out_ref, *, th):
    """Fallback 2-D path (H*W not a multiple of 128): (rows x W) tiles."""
    b = pl.program_id(0)
    t = pl.program_id(1)
    w = depth_ref.shape[2]

    depth = depth_ref[0].astype(jnp.float32)                      # (th, w)

    x = lax.broadcasted_iota(jnp.int32, (th, w), 1).astype(jnp.float32)
    y = (t * th + lax.broadcasted_iota(jnp.int32, (th, w), 0)).astype(jnp.float32)

    for r in range(3):
        k0 = invk_ref[b, 3 * r + 0]
        k1 = invk_ref[b, 3 * r + 1]
        k2 = invk_ref[b, 3 * r + 2]
        out_ref[0, r] = ((k0 * x + k1 * y + k2) * depth).astype(out_ref.dtype)

    out_ref[0, 3] = jnp.ones((th, w), out_ref.dtype)


# ----------------------------------------------------------------------------
# Block-size selection
# ----------------------------------------------------------------------------
def _pick_block_len(n_batch, extent, bytes_per_unit, align=8,
                    max_block_bytes=4 << 20, min_steps=8):
    """Block length along the tiled axis.

    Must be a multiple of `align` or the full extent (Mosaic (8,128) rule on
    the second-to-last block dim).  Prefer the largest length within the byte
    budget whose total grid-step count is >= min_steps and even (v7x has two
    TensorCores sharding parallel grid axes).
    """
    if extent <= align:
        return extent

    cap = max(align, min((max_block_bytes // bytes_per_unit) // align * align,
                         -(-extent // align) * align))
    cands = {cap}
    length = cap
    while length > align:
        length = max(align, (length // 2) // align * align)
        cands.add(length)
    if extent * bytes_per_unit <= max_block_bytes:
        cands.add(extent)                      # full extent is always legal
    cands = sorted(cands, reverse=True)

    def steps(l):
        return n_batch * (-(-extent // l))

    for ok in (lambda s: s >= min_steps and s % 2 == 0,
               lambda s: s % 2 == 0,
               lambda s: True):
        for l in cands:
            if ok(steps(l)):
                return l
    return align


# ----------------------------------------------------------------------------
# Wrapper
# ----------------------------------------------------------------------------
def backproject_depth(depth, inv_K, height, width):
    """depth: (B, 1, H, W) any float dtype; inv_K: (B, 4, 4) -> (B, 4, H*W) f32."""
    B = depth.shape[0]
    H, W = int(height), int(width)
    HW = H * W

    invk_flat = inv_K[:, :3, :3].reshape(B, 9).astype(jnp.float32)
    compiler_params = pltpu.CompilerParams(
        dimension_semantics=("parallel", "parallel"),
        vmem_limit_bytes=32 << 20,
    )

    flat_ok = (HW % 128 == 0) and (HW < (1 << 23))
    if flat_ok:
        # Lane-dense path: view the image as (HP, 128) pixel rows.
        HP = HW // 128
        sb = _pick_block_len(B, HP, bytes_per_unit=4 * 128 * 4)   # out bytes/row
        depth_t = depth.reshape(B, HP, 128)                       # free reshape
        grid = (B, -(-HP // sb))
        out = pl.pallas_call(
            functools.partial(_flat_kernel, sb=sb, width=W),
            out_shape=jax.ShapeDtypeStruct((B, 4, HP, 128), jnp.float32),
            grid_spec=pltpu.PrefetchScalarGridSpec(
                num_scalar_prefetch=1,          # inv_K (B, 9) -> SMEM scalars
                grid=grid,
                in_specs=[pl.BlockSpec((1, sb, 128),
                                       lambda b, c, invk: (b, c, 0))],
                out_specs=pl.BlockSpec((1, 4, sb, 128),
                                       lambda b, c, invk: (b, 0, c, 0)),
            ),
            compiler_params=compiler_params,
        )(invk_flat, depth_t)
    else:
        # Fallback: (rows x W) tiles; lane density limited by W.
        th = _pick_block_len(B, H, bytes_per_unit=4 * W * 4)
        depth_t = depth.reshape(B, H, W)
        grid = (B, -(-H // th))
        out = pl.pallas_call(
            functools.partial(_rows_kernel, th=th),
            out_shape=jax.ShapeDtypeStruct((B, 4, H, W), jnp.float32),
            grid_spec=pltpu.PrefetchScalarGridSpec(
                num_scalar_prefetch=1,
                grid=grid,
                in_specs=[pl.BlockSpec((1, th, W),
                                       lambda b, t, invk: (b, t, 0))],
                out_specs=pl.BlockSpec((1, 4, th, W),
                                       lambda b, t, invk: (b, 0, t, 0)),
            ),
            compiler_params=compiler_params,
        )(invk_flat, depth_t)

    # Contiguous (free) reshape to torch's (B, 4, H*W) cam_points layout.
    return out.reshape(B, 4, HW)


# ----------------------------------------------------------------------------
# Reference + test
# ----------------------------------------------------------------------------
def _reference(depth, inv_K, height, width):
    """Pure-JAX reference mirroring the torch forward."""
    B = depth.shape[0]
    HW = height * width
    xs, ys = jnp.meshgrid(
        jnp.arange(width, dtype=jnp.float32),
        jnp.arange(height, dtype=jnp.float32),
        indexing="xy",
    )
    pix = jnp.stack(
        [xs.reshape(-1), ys.reshape(-1), jnp.ones((HW,), jnp.float32)], axis=0
    )
    pix = jnp.broadcast_to(pix, (B, 3, HW))
    cam = jnp.einsum("bij,bjk->bik", inv_K[:, :3, :3], pix)
    cam = depth.reshape(B, 1, HW).astype(jnp.float32) * cam
    ones = jnp.ones((B, 1, HW), jnp.float32)
    return jnp.concatenate([cam, ones], axis=1)


if __name__ == "__main__":
    B, H, W = 2, 16, 16
    key = jax.random.PRNGKey(0)
    k_depth, k_k = jax.random.split(key)

    depth = jax.random.uniform(k_depth, (B, 1, H, W), jnp.float32, 0.1, 10.0)

    # Deterministic plausible inverse intrinsics (B, 4, 4).
    fx, fy, cx, cy = 0.58 * W, 1.92 * H, 0.5 * W, 0.5 * H
    K = jnp.array(
        [[fx, 0.0, cx, 0.0],
         [0.0, fy, cy, 0.0],
         [0.0, 0.0, 1.0, 0.0],
         [0.0, 0.0, 0.0, 1.0]],
        dtype=jnp.float32,
    )
    inv_K = jnp.broadcast_to(jnp.linalg.inv(K), (B, 4, 4))
    # Small per-batch perturbation so batches differ.
    inv_K = inv_K + 1e-3 * jax.random.normal(k_k, (B, 4, 4), jnp.float32)

    out = backproject_depth(depth, inv_K, H, W)
    out = jax.block_until_ready(out)

    ref = _reference(depth, inv_K, H, W)
    np.testing.assert_allclose(np.asarray(out), np.asarray(ref), rtol=1e-5, atol=1e-5)

    print("KERNEL_OK")
</pallas_src>

<mosaic_0001>
module attributes {stable_mosaic.version = 11 : i64} {
  func.func @_flat_kernel(%arg0: i32, %arg1: i32, %arg2: memref<2x9xf32, #tpu.memory_space<smem>>, %arg3: memref<1x2x128xf32, #tpu.memory_space<vmem>>, %arg4: memref<1x4x2x128xf32, #tpu.memory_space<vmem>>) attributes {dimension_semantics = [#tpu.dimension_semantics<parallel>, #tpu.dimension_semantics<parallel>], iteration_bounds = array<i64: 2, 1>, scalar_prefetch = 1 : i64, scratch_operands = 0 : i64, tpu.core_type = #tpu.core_type<tc>, window_params = [{transform_indices = @transform_0, window_bounds = array<i64: 1, 2, 128>}, {transform_indices = @transform_1, window_bounds = array<i64: 1, 4, 2, 128>}]} {
    %c0 = arith.constant 0 : index
    %c0_0 = arith.constant 0 : index
    %c0_1 = arith.constant 0 : index
    %0 = vector.load %arg3[%c0, %c0_0, %c0_1] : memref<1x2x128xf32, #tpu.memory_space<vmem>>, vector<1x2x128xf32>
    %1 = vector.shape_cast %0 : vector<1x2x128xf32> to vector<2x128xf32>
    %c2_i32 = arith.constant 2 : i32
    %2 = arith.muli %arg1, %c2_i32 : i32
    %3 = tpu.iota {dimensions = array<i32: 0>} : vector<2x128xi32>
    %4 = vector.broadcast %2 : i32 to vector<2x128xi32>
    %5 = arith.addi %4, %3 : vector<2x128xi32>
    %c128_i32 = arith.constant 128 : i32
    %6 = vector.broadcast %c128_i32 : i32 to vector<2x128xi32>
    %7 = arith.muli %5, %6 : vector<2x128xi32>
    %8 = tpu.iota {dimensions = array<i32: 1>} : vector<2x128xi32>
    %9 = arith.addi %7, %8 : vector<2x128xi32>
    %10 = arith.sitofp %9 : vector<2x128xi32> to vector<2x128xf32>
    %cst = arith.constant 6.250000e-02 : f32
    %11 = vector.broadcast %cst : f32 to vector<2x128xf32>
    %12 = arith.mulf %10, %11 : vector<2x128xf32>
    %13 = math.floor %12 : vector<2x128xf32>
    %cst_2 = arith.constant 1.600000e+01 : f32
    %14 = vector.broadcast %cst_2 : f32 to vector<2x128xf32>
    %15 = arith.mulf %13, %14 : vector<2x128xf32>
    %16 = arith.subf %10, %15 : vector<2x128xf32>
    %cst_3 = arith.constant 0.000000e+00 : f32
    %17 = vector.broadcast %cst_3 : f32 to vector<2x128xf32>
    %18 = arith.cmpf olt, %16, %17 : vector<2x128xf32>
    %cst_4 = arith.constant 1.000000e+00 : f32
    %19 = vector.broadcast %cst_4 : f32 to vector<2x128xf32>
    %20 = arith.subf %13, %19 : vector<2x128xf32>
    %21 = arith.select %18, %20, %13 : vector<2x128xi1>, vector<2x128xf32>
    %cst_5 = arith.constant 0.000000e+00 : f32
    %22 = vector.broadcast %cst_5 : f32 to vector<2x128xf32>
    %23 = arith.cmpf olt, %16, %22 : vector<2x128xf32>
    %cst_6 = arith.constant 1.600000e+01 : f32
    %24 = vector.broadcast %cst_6 : f32 to vector<2x128xf32>
    %25 = arith.addf %16, %24 : vector<2x128xf32>
    %26 = arith.select %23, %25, %16 : vector<2x128xi1>, vector<2x128xf32>
    %cst_7 = arith.constant 1.600000e+01 : f32
    %27 = vector.broadcast %cst_7 : f32 to vector<2x128xf32>
    %28 = arith.cmpf oge, %26, %27 : vector<2x128xf32>
    %cst_8 = arith.constant 1.000000e+00 : f32
    %29 = vector.broadcast %cst_8 : f32 to vector<2x128xf32>
    %30 = arith.addf %21, %29 : vector<2x128xf32>
    %31 = arith.select %28, %30, %21 : vector<2x128xi1>, vector<2x128xf32>
    %cst_9 = arith.constant 1.600000e+01 : f32
    %32 = vector.broadcast %cst_9 : f32 to vector<2x128xf32>
    %33 = arith.cmpf oge, %26, %32 : vector<2x128xf32>
    %cst_10 = arith.constant 1.600000e+01 : f32
    %34 = vector.broadcast %cst_10 : f32 to vector<2x128xf32>
    %35 = arith.subf %26, %34 : vector<2x128xf32>
    %36 = arith.select %33, %35, %26 : vector<2x128xi1>, vector<2x128xf32>
    %37 = arith.index_cast %arg0 : i32 to index
    %c0_11 = arith.constant 0 : index
    %38 = memref.load %arg2[%37, %c0_11] : memref<2x9xf32, #tpu.memory_space<smem>>
    %39 = arith.index_cast %arg0 : i32 to index
    %c1 = arith.constant 1 : index
    %40 = memref.load %arg2[%39, %c1] : memref<2x9xf32, #tpu.memory_space<smem>>
    %41 = arith.index_cast %arg0 : i32 to index
    %c2 = arith.constant 2 : index
    %42 = memref.load %arg2[%41, %c2] : memref<2x9xf32, #tpu.memory_space<smem>>
    %43 = vector.broadcast %38 : f32 to vector<2x128xf32>
    %44 = arith.mulf %43, %36 : vector<2x128xf32>
    %45 = vector.broadcast %40 : f32 to vector<2x128xf32>
    %46 = arith.mulf %45, %31 : vector<2x128xf32>
    %47 = arith.addf %44, %46 : vector<2x128xf32>
    %48 = vector.broadcast %42 : f32 to vector<2x128xf32>
    %49 = arith.addf %47, %48 : vector<2x128xf32>
    %50 = arith.mulf %49, %1 : vector<2x128xf32>
    %c0_12 = arith.constant 0 : index
    %c0_13 = arith.constant 0 : index
    %c0_14 = arith.constant 0 : index
    %c0_15 = arith.constant 0 : index
    %51 = vector.load %arg4[%c0_12, %c0_13, %c0_14, %c0_15] : memref<1x4x2x128xf32, #tpu.memory_space<vmem>>, vector<1x1x2x128xf32>
    %52 = vector.shape_cast %51 : vector<1x1x2x128xf32> to vector<2x128xf32>
    %53 = vector.shape_cast %50 : vector<2x128xf32> to vector<1x1x2x128xf32>
    tpu.vector_store %arg4[%c0_12, %c0_13, %c0_14, %c0_15], %53 {strides = array<i32>} : memref<1x4x2x128xf32, #tpu.memory_space<vmem>>, vector<1x1x2x128xf32>,
    %54 = arith.index_cast %arg0 : i32 to index
    %c3 = arith.constant 3 : index
    %55 = memref.load %arg2[%54, %c3] : memref<2x9xf32, #tpu.memory_space<smem>>
    %56 = arith.index_cast %arg0 : i32 to index
    %c4 = arith.constant 4 : index
    %57 = memref.load %arg2[%56, %c4] : memref<2x9xf32, #tpu.memory_space<smem>>
    %58 = arith.index_cast %arg0 : i32 to index
    %c5 = arith.constant 5 : index
    %59 = memref.load %arg2[%58, %c5] : memref<2x9xf32, #tpu.memory_space<smem>>
    %60 = vector.broadcast %55 : f32 to vector<2x128xf32>
    %61 = arith.mulf %60, %36 : vector<2x128xf32>
    %62 = vector.broadcast %57 : f32 to vector<2x128xf32>
    %63 = arith.mulf %62, %31 : vector<2x128xf32>
    %64 = arith.addf %61, %63 : vector<2x128xf32>
    %65 = vector.broadcast %59 : f32 to vector<2x128xf32>
    %66 = arith.addf %64, %65 : vector<2x128xf32>
    %67 = arith.mulf %66, %1 : vector<2x128xf32>
    %c0_16 = arith.constant 0 : index
    %c1_17 = arith.constant 1 : index
    %c0_18 = arith.constant 0 : index
    %c0_19 = arith.constant 0 : index
    %68 = vector.load %arg4[%c0_16, %c1_17, %c0_18, %c0_19] : memref<1x4x2x128xf32, #tpu.memory_space<vmem>>, vector<1x1x2x128xf32>
    %69 = vector.shape_cast %68 : vector<1x1x2x128xf32> to vector<2x128xf32>
    %70 = vector.shape_cast %67 : vector<2x128xf32> to vector<1x1x2x128xf32>
    tpu.vector_store %arg4[%c0_16, %c1_17, %c0_18, %c0_19], %70 {strides = array<i32>} : memref<1x4x2x128xf32, #tpu.memory_space<vmem>>, vector<1x1x2x128xf32>,
    %71 = arith.index_cast %arg0 : i32 to index
    %c6 = arith.constant 6 : index
    %72 = memref.load %arg2[%71, %c6] : memref<2x9xf32, #tpu.memory_space<smem>>
    %73 = arith.index_cast %arg0 : i32 to index
    %c7 = arith.constant 7 : index
    %74 = memref.load %arg2[%73, %c7] : memref<2x9xf32, #tpu.memory_space<smem>>
    %75 = arith.index_cast %arg0 : i32 to index
    %c8 = arith.constant 8 : index
    %76 = memref.load %arg2[%75, %c8] : memref<2x9xf32, #tpu.memory_space<smem>>
    %77 = vector.broadcast %72 : f32 to vector<2x128xf32>
    %78 = arith.mulf %77, %36 : vector<2x128xf32>
    %79 = vector.broadcast %74 : f32 to vector<2x128xf32>
    %80 = arith.mulf %79, %31 : vector<2x128xf32>
    %81 = arith.addf %78, %80 : vector<2x128xf32>
    %82 = vector.broadcast %76 : f32 to vector<2x128xf32>
    %83 = arith.addf %81, %82 : vector<2x128xf32>
    %84 = arith.mulf %83, %1 : vector<2x128xf32>
    %c0_20 = arith.constant 0 : index
    %c2_21 = arith.constant 2 : index
    %c0_22 = arith.constant 0 : index
    %c0_23 = arith.constant 0 : index
    %85 = vector.load %arg4[%c0_20, %c2_21, %c0_22, %c0_23] : memref<1x4x2x128xf32, #tpu.memory_space<vmem>>, vector<1x1x2x128xf32>
    %86 = vector.shape_cast %85 : vector<1x1x2x128xf32> to vector<2x128xf32>
    %87 = vector.shape_cast %84 : vector<2x128xf32> to vector<1x1x2x128xf32>
    tpu.vector_store %arg4[%c0_20, %c2_21, %c0_22, %c0_23], %87 {strides = array<i32>} : memref<1x4x2x128xf32, #tpu.memory_space<vmem>>, vector<1x1x2x128xf32>,
    %cst_24 = arith.constant 1.000000e+00 : f32
    %88 = vector.broadcast %cst_24 : f32 to vector<2x128xf32>
    %c0_25 = arith.constant 0 : index
    %c3_26 = arith.constant 3 : index
    %c0_27 = arith.constant 0 : index
    %c0_28 = arith.constant 0 : index
    %89 = vector.load %arg4[%c0_25, %c3_26, %c0_27, %c0_28] : memref<1x4x2x128xf32, #tpu.memory_space<vmem>>, vector<1x1x2x128xf32>
    %90 = vector.shape_cast %89 : vector<1x1x2x128xf32> to vector<2x128xf32>
    %91 = vector.shape_cast %88 : vector<2x128xf32> to vector<1x1x2x128xf32>
    tpu.vector_store %arg4[%c0_25, %c3_26, %c0_27, %c0_28], %91 {strides = array<i32>} : memref<1x4x2x128xf32, #tpu.memory_space<vmem>>, vector<1x1x2x128xf32>,
    return
  }
  func.func @transform_0(%arg0: i32, %arg1: i32, %arg2: memref<2x9xf32, #tpu.memory_space<smem>>) -> (i32, i32, i32) {
    %c0_i32 = arith.constant 0 : i32
    %c0_i32_0 = arith.constant 0 : i32
    return %arg0, %arg1, %c0_i32 : i32, i32, i32
  }
  func.func @transform_1(%arg0: i32, %arg1: i32, %arg2: memref<2x9xf32, #tpu.memory_space<smem>>) -> (i32, i32, i32, i32) {
    %c0_i32 = arith.constant 0 : i32
    %c0_i32_0 = arith.constant 0 : i32
    %c0_i32_1 = arith.constant 0 : i32
    return %arg0, %c0_i32, %arg1, %c0_i32_0 : i32, i32, i32, i32
  }
}

</mosaic_0001>

<bundles_post_ra>
// kernel: tpu_custom_call.1
= control target key start
LH: loop header
LB: loop body
LE: loop exit
PB: predicated region body
PF: predicated region fallthrough
CT: control target
= control target key end

     0   :  { %s782_s0 = inlined_call_operand.hbm [shape: f32[2,9], index: 0, kind: input, shape index: {}]   ;;  %s783_s1 = inlined_call_operand.hbm [shape: f32[2,2,128], index: 1, kind: input, shape index: {}]   ;;  %s784_s2 = inlined_call_operand.hbm [shape: f32[2,4,2,128], index: 2, kind: output, shape index: {}]  }
   0x1   :  { %786 = sst [smem:[#allocation11_spill]] %s783_s1  ;;  %s414_s11 = scalar_lea.hbm %s782_s0, 32 }
   0x2   :  { %p415_p0 = scmp.ne.s32.totalorder %s782_s0, %s414_s11  ;;  %p418_p1 = scmp.lt.u32.totalorder %s414_s11, %s782_s0 }
   0x4   :  { %p420_p2 = pnand %p418_p1, %p415_p0 }
   0x6   :  { %423 = shalt.err (!%p420_p2)  }
   0x7   :  { %s540_s16 = smov [#allocation3]  }
   0x8   :  { %8 = dma.hbm_to_smem %s782_s0, 32, %s540_s16, [#allocation2] }
   0x9   :  { %506 = dma.done.wait [#allocation2], 32 }
   0xa   :  { %507 = vsyncadd [#allocation2], 4294967264 }
   0xb   :  { %10 = sfence }
   0xc   :  { %11 = vsyncpa [#allocation5], 0 }
   0xd   :  { %13 = vsyncpa [#allocation5 + $0x1], 0 }
   0xe   :  { %14 = vsyncpa [#allocation6], 0 }
   0xf   :  { %16 = vsyncpa [#allocation6 + $0x1], 0  ;;  %s573_s19 = smov 0   ;;  %s575_s20 = smov 0  }
  0x10   :  { %s577_s21 = smov 0   ;;  %s579_s22 = smov 0  }
  0x11   :  { %s581_s23 = smov 0   ;;  %s583_s24 = smov 0  }
  0x12 LB: > { %s327_s0 = sadd.s32 4294967295, %s538_s24   ;;  %s328_s25 = sadd.s32 4294967294, %s538_s24   ;;  %s538_s24 = sphi %s583_s24, %s22_s24   ;;  %s534_s23 = sphi %s581_s23, %s802_s23   ;;  %s530_s22 = sphi %s579_s22, %s801_s22   ;;  %s526_s21 = sphi %s577_s21, %s800_s21   ;;  %s522_s20 = sphi %s575_s20, %s799_s20   ;;  %s518_s19 = sphi %s573_s19, %s798_s19  }
  0x13   : > { %s34_s26 = sadd.s32 1, %s534_s23  ;;  %s43_s27 = sadd.s32 1, %s526_s21 }
  0x14   : > { %p36_p3 = scmp.ge.s32.totalorder %s34_s26, 2  ;;  %p50_p4 = scmp.ne.s32.totalorder %s526_s21, %s522_s20 }
  0x15   : > { %p51_p5 = scmp.eq.s32.totalorder %s538_s24, 0  ;;  %p56_p6 = scmp.ne.s32.totalorder %s522_s20, %s518_s19 }
  0x16   : > { %s804_s26 = smov (%p36_p3, %s34_s26), 0  ;;  %p57_p8 = scmp.eq.s32.totalorder %s327_s0, 0 }
  0x17   : > { %p614_p7 = por %p51_p5, %p50_p4  ;;  %s38_s29 = ssub.s32 %s534_s23, %s804_s26 }
  0x18   : > { %p82_p9 = scmp.eq.s32.totalorder %s327_s0, 1  ;;  %p41_p10 = scmp.eq.s32.totalorder %s38_s29, 0 }
  0x19   : > { %p620_p11 = por %p57_p8, %p56_p6  ;;  %p88_p13 = scmp.eq.s32.totalorder %s328_s25, 1 }
  0x1a   : > { %p624_p12 = por %p82_p9, %p50_p4  ;;  %p360_p2 = scmp.lt.s32.totalorder %s538_s24, 2 }
  0x1b   : > { %s629_s4 = scalar_select %p41_p10, %s526_s21, %s43_s27  }
  0x1c   : > { %s789_s3 = scalar_select %p624_p12, 1, 0 }
  0x1d   : > { %p631_p0 = por %p88_p13, %p56_p6  ;;  %s108_s6 = sand.u32 1, %s526_s21  }
  0x1e   : > { %s331_s7 = sshll.u32 %s108_s6, 1  ;;  %s332_s8 = sshll.u32 %s534_s23, 5 }
  0x1f   : > { %s790_s5 = scalar_select %p631_p0, 1, 0 }
  0x20   : > { %s791_s1 = sld [smem:[#allocation11_spill]]  ;;  %s112_s12 = scalar_lea.vmem [#allocation4], %s331_s7 }
  0x21   : > { %s120_s13 = sshll.u32 %s112_s12, 4  ;;  %p648_p3 = pnand %p360_p2, %p614_p7  ;;  %s644_s13 = int_to_ptr.vmem [resolvable:$true] %s120_s13 }
  0x22   : > { %s109_s15 = scalar_lea.sflag [#allocation5], %s108_s6 }
  0x23   : > { %p426_p8 = pneg %p648_p3 }
  0x26   : > { %s642_s11 = scalar_lea.hbm %s791_s1, %s332_s8  ;;  %s429_s0 = scalar_lea.hbm %s791_s1, 64 }
  0x27   : > { %s424_s16 = scalar_lea.hbm %s642_s11, 32  ;;  %p430_p7 = scmp.lt.u32.totalorder %s642_s11, %s791_s1 }
  0x28   : > { %p425_p6 = scmp.ne.s32.totalorder %s642_s11, %s424_s16  ;;  %p431_p13 = scmp.lt.u32.totalorder %s429_s0, %s424_s16 }
  0x29   : > { %p433_p1 = scmp.lt.u32.totalorder %s424_s16, %s642_s11 }
  0x2a   : > { %p427_p9 = pnand %p426_p8, %p425_p6  ;;  %p432_p2 = por %p431_p13, %p430_p7 }
  0x2c   : > { %p428_p10 = pneg %p427_p9  ;;  %p434_p4 = por %p433_p1, %p432_p2 }
  0x2e   : > { %p435_p5 = pnand %p434_p4, %p428_p10 }
  0x30   : > { %438 = shalt.err (!%p435_p5)
}
  0x31   : > { %s439_s28 = scalar_lea.vmem %s644_s13, 32  ;;  %s541_s29 = smov [#allocation4]  }
  0x32   : > { %p440_p6 = scmp.ne.s32.totalorder %s644_s13, %s439_s28  ;;  %s444_s6 = sshll.u32 %s541_s29, 4  ;;  %s445_s6 = int_to_ptr.vmem [resolvable:$false] %s444_s6 }
  0x33   : > { %s446_s7 = scalar_lea.vmem %s445_s6, 64  ;;  %p447_p12 = scmp.lt.s32.totalorder %s644_s13, %s445_s6 }
  0x34   : > { %p442_p9 = pnand %p440_p6, %p426_p8  ;;  %p448_p7 = scmp.lt.s32.totalorder %s446_s7, %s439_s28 }
  0x36   : > { %p443_p0 = pneg %p442_p9  ;;  %p449_p13 = por %p448_p7, %p447_p12 }
  0x38   : > { %p450_p1 = pnand %p449_p13, %p443_p0 }
  0x3a   : > { %453 = shalt.err (!%p450_p1)
}
  0x3b   : > { %355 = dma.hbm_to_vmem [thread:$0]  (!%p648_p3), %s642_s11, 32, %s644_s13, %s109_s15  }
  0x3c   : > { %p793_p4 = scmp.lt.s32.totalorder %s538_s24, 3  ;;  %p794_p5 = scmp.ge.s32.totalorder %s538_s24, 1 }
  0x3e   : > { %p126_p8 = pnand %p794_p5, %p793_p4 }
  0x3f   : > { %s684_s8 = sand.u32 (!%p126_p8), 1, %s522_s20  }
  0x40   : > { %129 = sbr.rel (%p126_p8) target bundleno = 120 (0x78), region = 24  ;;  %s334_s9 = sshll.u32 (!%p126_p8), %s684_s8, 1 }
  0x41   : > { %s132_s10 = scalar_lea.sflag (!%p126_p8), [#allocation5], %s684_s8  ;;  %s688_s12 = scalar_lea.vmem (!%p126_p8), [#allocation4], %s334_s9 }
  0x47   : > { %509 = dma.done.wait (%p620_p11), %s132_s10, 32  }
  0x48   : > { %511 = vsyncadd (%p620_p11), %s132_s10, 4294967264  ;;  %s335_s11 = sshll.u32 %s684_s8, 3  ;;  %v156_v0 = vlaneseq  ;;  %v542_v3 = vmov 1.0   ;;  %s699_s14 = sshll.u32 %s530_s22, 7  ;;  %v154_v37 = vld [vmem:[%s688_s12] sm:$0x3] }
  0x49   : > { %s695_s13 = scalar_lea.vmem [#allocation7], %s335_s11  ;;  %s702_s30 = sld [smem:[#allocation3 + %s699_s14]] }
  0x4a   : > { %v157_v1 = vshrl.u32 %v156_v0, 7  ;;  %v162_v2 = vand.u32 127, %v156_v0  ;;  %341 = vst [vmem:[%s695_s13 + $0x6] sm:$0x3] %v542_v3  ;;  %s181_s15 = sadd.s32 1, %s699_s14  ;;  %s196_s16 = sadd.s32 4, %s699_s14 }
  0x4b   : > { %s212_s17 = sadd.s32 7, %s699_s14  ;;  %s194_s18 = sadd.s32 3, %s699_s14 }
  0x4c   : > { %v160_v4 = vmul.u32 128, %v157_v1  ;;  %s210_s22 = sadd.s32 6, %s699_s14  ;;  %s182_s0 = sld [smem:[#allocation3 + %s181_s15]] }
  0x4d   : > { %s183_s25 = sadd.s32 2, %s699_s14  ;;  %s197_s27 = sld [smem:[#allocation3 + %s196_s16]] }
  0x4e   : > { %v163_v5 = vadd.s32 %v162_v2, %v160_v4  ;;  %s213_s28 = sld [smem:[#allocation3 + %s212_s17]]  ;;  %s198_s7 = sadd.s32 5, %s699_s14 }
  0x4f   : > { %s195_s29 = sld [smem:[#allocation3 + %s194_s18]]  ;;  %s214_s9 = sadd.s32 8, %s699_s14  ;;  %v185_v14 = vstv %s702_s30 }
  0x50   : > { %v164_v6 = vcvt.s32.f32 %v163_v5  ;;  %s211_s6 = sld [smem:[#allocation3 + %s210_s22]]  ;;  %s243_s30 = sshll.u32 %s695_s13, 4  ;;  %s724_s30 = int_to_ptr.vmem [resolvable:$true] %s243_s30 }
  0x51   : > { %s712_s10 = sld [smem:[#allocation3 + %s183_s25]]  ;;  %s730_s17 = scalar_lea.hbm %s784_s2, %s699_s14 }
  0x52   : > { %v165_v7 = vmul.f32 0.0625, %v164_v6  ;;  %s714_s11 = sld [smem:[#allocation3 + %s198_s7]]  ;;  %v187_v15 = vstv %s182_s0  ;;  %s454_s12 = scalar_lea.vmem %s724_s30, 128 }
  0x53   : > { %s716_s1 = sld [smem:[#allocation3 + %s214_s9]]  ;;  %v202_v18 = vstv %s197_s27  ;;  %p455_p11 = scmp.ne.s32.totalorder %s724_s30, %s454_s12 }
  0x54   : > { %v166_v8 = vfloor.f32 %v165_v7  ;;  %v218_v19 = vstv %s213_s28  ;;  %p795_p12 = scmp.ne.s32.totalorder %s789_s3, 0  ;;  %s543_s18 = smov [#allocation7]  }
  0x55   : > { %v200_v21 = vstv %s195_s29  ;;  %s458_s22 = sshll.u32 %s543_s18, 4  ;;  %s459_s22 = int_to_ptr.vmem [resolvable:$false] %s458_s22 }
  0x56   : > { %v167_v9 = vmul.f32 16.0, %v166_v8  ;;  %v336_v10 = vadd.f32 -1.0, %v166_v8  ;;  %v216_v22 = vstv %s211_s6  ;;  %p456_p0 = pnand %p455_p11, %p795_p12  ;;  %s460_s0 = scalar_lea.vmem %s459_s22, 256 }
  0x57   : > { %v190_v31 = vstv %s712_s10  ;;  %p461_p10 = scmp.lt.s32.totalorder %s724_s30, %s459_s22  ;;  %p462_p2 = scmp.lt.s32.totalorder %s460_s0, %s454_s12 }
  0x58   : > { %v168_v11 = vsub.f32 %v164_v6, %v167_v9  ;;  %v205_v32 = vstv %s714_s11  ;;  %p457_p3 = pneg %p456_p0 }
  0x59   : > { %v221_v33 = vstv %s716_s1  ;;  %s229_s1 = scalar_lea.sflag [#allocation6], %s684_s8  ;;  %p463_p6 = por %p462_p2, %p461_p10 }
  0x5a   : > { %vm169_vm0 = vcmp.lt.f32.partialorder %v168_v11, 0.0  ;;  %v172_v12 = vadd.f32 16.0, %v168_v11 }
  0x5b   : > { %v171_v13 = vsel %vm169_vm0, %v336_v10, %v166_v8  ;;  %p464_p9 = pnand %p463_p6, %p457_p3 }
  0x5c   : > { %v173_v16 = vsel %vm169_vm0, %v172_v12, %v168_v11  ;;  %v175_v17 = vadd.f32 1.0, %v171_v13 }
  0x5d   : > { %vm174_vm1 = vcmp.ge.f32.partialorder %v173_v16, 16.0  ;;  %v337_v20 = vadd.f32 -16.0, %v173_v16 }
  0x5e   : > { %v176_v23 = vsel %vm174_vm1, %v175_v17, %v171_v13 }
  0x5f   : > { %v178_v24 = vsel %vm174_vm1, %v337_v20, %v173_v16  ;;  %v188_v25 = vmul.f32 %v187_v15, %v176_v23  ;;  %v203_v26 = vmul.f32 %v202_v18, %v176_v23  ;;  %v219_v27 = vmul.f32 %v218_v19, %v176_v23 }
  0x60   : > { %v186_v28 = vmul.f32 %v185_v14, %v178_v24  ;;  %v201_v29 = vmul.f32 %v200_v21, %v178_v24  ;;  %v217_v30 = vmul.f32 %v216_v22, %v178_v24 }
  0x62   : > { %v189_v34 = vadd.f32 %v188_v25, %v186_v28  ;;  %v204_v35 = vadd.f32 %v203_v26, %v201_v29  ;;  %v220_v36 = vadd.f32 %v219_v27, %v217_v30 }
  0x64   : > { %v191_v38 = vadd.f32 %v190_v31, %v189_v34  ;;  %v206_v39 = vadd.f32 %v205_v32, %v204_v35  ;;  %v222_v40 = vadd.f32 %v221_v33, %v220_v36 }
  0x66   : > { %v192_v41 = vmul.f32 %v191_v38, %v154_v37  ;;  %v207_v42 = vmul.f32 %v206_v39, %v154_v37  ;;  %v223_v43 = vmul.f32 %v222_v40, %v154_v37 }
  0x68   : > { %193 = vst [vmem:[%s695_s13] sm:$0x3] %v192_v41  ;;  %339 = vst [vmem:[%s695_s13 + $0x2] sm:$0x3] %v207_v42 }
  0x69   : > { %340 = vst [vmem:[%s695_s13 + $0x4] sm:$0x3] %v223_v43 }
  0x6a   : > { %467 = shalt.err (!%p464_p9)
}
  0x6b   : > { %s468_s13 = scalar_lea.hbm %s730_s17, 128  ;;  %s472_s27 = scalar_lea.hbm %s784_s2, 256 }
  0x6c   : > { %p469_p7 = scmp.ne.s32.totalorder %s730_s17, %s468_s13  ;;  %p473_p4 = scmp.lt.u32.totalorder %s730_s17, %s784_s2 }
  0x6d   : > { %p474_p5 = scmp.lt.u32.totalorder %s472_s27, %s468_s13  ;;  %p476_p11 = scmp.lt.u32.totalorder %s468_s13, %s730_s17 }
  0x6e   : > { %p470_p13 = pnand %p469_p7, %p795_p12 }
  0x6f   : > { %p475_p8 = por %p474_p5, %p473_p4 }
  0x70   : > { %p471_p1 = pneg %p470_p13 }
  0x71   : > { %p477_p0 = por %p476_p11, %p475_p8 }
  0x73   : > { %p478_p3 = pnand %p477_p0, %p471_p1 }
  0x75   : > { %481 = shalt.err (!%p478_p3)
}
  0x76   : > { %s544_s6 = smov 32   ;;  %s545_s7 = smov 2  }
  0x77   : > { %350 = dma.vmem_to_hbm [thread:$0]  (%p795_p12), %s724_s30, 128, %s730_s17, %s229_s1, %s544_s6, %s544_s6, %s545_s7  }
  0x78 PF: > { %s258_s9 = sand.u32 1, %s518_s19   ;;  %p796_p10 = scmp.ne.s32.totalorder %s790_s5, 0 }
  0x79   : > { %p797_p2 = scmp.ge.s32.totalorder %s538_s24, 2  ;;  %s259_s10 = scalar_lea.sflag [#allocation6], %s258_s9 }
  0x7b   : > { %p357_p6 = pnand %p797_p2, %p796_p10 }
  0x7d   : > { %513 = dma.done.wait (!%p357_p6), %s259_s10, 128  }
  0x7e   : > { %515 = vsyncadd (!%p357_p6), %s259_s10, 4294967168  ;;  %s22_s24 = sadd.s32 1, %s538_s24   ;;  %s798_s19 = smov %s522_s20 }
  0x7f   : > { %p19_p9 = scmp.ge.s32.totalorder %s22_s24, 4   ;;  %s799_s20 = smov %s526_s21 }
  0x80   : > { %s800_s21 = smov %s629_s4  ;;  %s801_s22 = smov %s534_s23 }
  0x81   : > { %s802_s23 = smov %s804_s26  ;;  %21 = sbr.rel (!%p19_p9) target bundleno = 18 (0x12), region = 72 }
  0x88   :  { %264 = vsyncpa [#allocation5], 1 }
  0x89   :  { %266 = vsyncpa [#allocation5 + $0x1], 1 }
  0x8a   :  { %267 = vsyncpa [#allocation6], 1 }
  0x8b   :  { %269 = vsyncpa [#allocation6 + $0x1], 1 }

</bundles_post_ra>
